<compile_context>
chip_gen: v5e
topology: v5e:2x2
jax: 0.10.0
libtpu: 0.0.40
codegen_flags: <defaults>
</compile_context>

<pallas_src>
import functools

import jax
import jax.numpy as jnp
from jax import lax
from jax.experimental import pallas as pl
from jax.experimental.pallas import tpu as pltpu

_EPS = 1e-4
_LANES = 128
_SUBLANES = 8
_CHUNK_ROWS = 64          # rows folded per inner-loop step (stays in vregs)
_TILE_ROWS_MAX = 8192     # rows per grid step; int8 -> 1 MiB / stream / buffer


def _round_up(x, m):
    return (x + m - 1) // m * m


def _make_count_kernel(num_cls, tile_rows, chunk):
    n_chunks = tile_rows // chunk
    folds = chunk // _SUBLANES

    def kernel(outs_ref, labs_ref, acc_ref):
        # outs_ref / labs_ref: (tile_rows, 128) class-index tiles (int8/int16/int32).
        # acc_ref: (1, num_cls, 2, 8, 128) f32, revisited across the inner grid axis.

        def fold(m):
            # (chunk,128) f32 -> (8,128) partial counts: pure VPU group adds,
            # no cross-lane (XLU) work in the hot loop.
            return jnp.sum(m.reshape(folds, _SUBLANES, _LANES), axis=0)

        def body(ci, carry):
            row0 = pl.multiple_of(ci * chunk, chunk)
            # Upcast once per chunk; all compares / ands / casts below operate on
            # a few vregs and die within the chunk, so nothing spills to VMEM.
            o = outs_ref[pl.ds(row0, chunk), :].astype(jnp.int32)
            l = labs_ref[pl.ds(row0, chunk), :].astype(jnp.int32)
            new = []
            for c in range(num_cls):
                i = c + 1
                o_eq = o == i
                l_eq = l == i
                inter = jnp.logical_and(o_eq, l_eq).astype(jnp.float32)
                denom = o_eq.astype(jnp.float32) + l_eq.astype(jnp.float32)
                new.append(carry[2 * c] + fold(inter))
                new.append(carry[2 * c + 1] + fold(denom))
            return tuple(new)

        # TODO(synk): for very large num_cls the 2*num_cls register-carried
        # accumulators will spill; split classes over an extra grid axis then.
        init = tuple(
            jnp.zeros((_SUBLANES, _LANES), jnp.float32) for _ in range(2 * num_cls)
        )
        part = lax.fori_loop(0, n_chunks, body, init, unroll=1)

        @pl.when(pl.program_id(1) == 0)
        def _():
            acc_ref[...] = jnp.zeros_like(acc_ref)

        # Single accumulator read-modify-write per (class, counter) per tile.
        for c in range(num_cls):
            acc_ref[0, c, 0] += part[2 * c]
            acc_ref[0, c, 1] += part[2 * c + 1]

    return kernel


def _as_class_map(x, num_classes, dtype):
    """Flatten and remap to the narrow streaming dtype.

    Values outside 1..num_classes never contribute to any dice score, so they
    are remapped to 0; this makes int8/int16 narrowing safe for arbitrary input
    values (e.g. ignore labels like 255).  For float inputs only exactly-integer
    labels count, matching `labs == i` in the reference.
    """
    xf = x.reshape(-1)
    xi = xf.astype(jnp.int32)
    keep = (xi >= 1) & (xi <= num_classes)
    if jnp.issubdtype(xf.dtype, jnp.floating):
        keep &= xf == xi.astype(xf.dtype)
    return jnp.where(keep, xi, 0).astype(dtype)


@functools.partial(jax.jit, static_argnames=("num_classes",))
def _dice_scores(outs, labs, *, num_classes):
    S = outs.size

    if num_classes <= 127:
        stream_dtype = jnp.int8
    elif num_classes <= 32767:
        stream_dtype = jnp.int16
    else:
        stream_dtype = jnp.int32

    outs_f = _as_class_map(outs, num_classes, stream_dtype)
    labs_f = _as_class_map(labs, num_classes, stream_dtype)

    # Tiling: pick tile_rows / nsplit / tiles_per_split so that the padded row
    # count is EXACTLY nsplit * tps * tile_rows -> no in-kernel mask or index
    # clamp, and every grid step does full useful work.
    rows_min = pl.cdiv(S, _LANES)
    if rows_min <= _TILE_ROWS_MAX:
        nsplit, tps = 1, 1
        tile_rows = _round_up(rows_min, _CHUNK_ROWS)
    elif rows_min <= 2 * _TILE_ROWS_MAX:
        nsplit, tps = 2, 1
        tile_rows = _round_up(pl.cdiv(rows_min, 2), _CHUNK_ROWS)
    else:
        nsplit = 2
        tile_rows = _TILE_ROWS_MAX
        tps = pl.cdiv(rows_min, nsplit * tile_rows)

    rows = nsplit * tps * tile_rows
    pad = rows * _LANES - S
    if pad:
        # Class-0 pad never scores; fused with the narrowing remap above.
        outs_f = jnp.pad(outs_f, (0, pad))
        labs_f = jnp.pad(labs_f, (0, pad))
    outs_2d = outs_f.reshape(rows, _LANES)
    labs_2d = labs_f.reshape(rows, _LANES)

    kernel = _make_count_kernel(num_classes, tile_rows, _CHUNK_ROWS)

    # TODO(synk): confirm on v7x (xprof) that the leading 'parallel' axis really
    # shards across both TensorCores; otherwise switch it to CORE_PARALLEL.
    acc = pl.pallas_call(
        kernel,
        out_shape=jax.ShapeDtypeStruct(
            (nsplit, num_classes, 2, _SUBLANES, _LANES), jnp.float32
        ),
        grid=(nsplit, tps),
        in_specs=[
            pl.BlockSpec((tile_rows, _LANES), lambda s, r: (s * tps + r, 0)),
            pl.BlockSpec((tile_rows, _LANES), lambda s, r: (s * tps + r, 0)),
        ],
        out_specs=pl.BlockSpec(
            (1, num_classes, 2, _SUBLANES, _LANES), lambda s, r: (s, 0, 0, 0, 0)
        ),
        compiler_params=pltpu.CompilerParams(
            dimension_semantics=("parallel", "arbitrary"),
            vmem_limit_bytes=32 * 1024 * 1024,
        ),
    )(outs_2d, labs_2d)

    # Per-(sublane,lane) counts are exact integers (each < 2^24), so the int32
    # cast is lossless; int32 totals stay exact up to ~2.1e9, i.e. volumes of
    # ~1G voxels even in the worst single-class case (vs 16.7M with f32 sums).
    sums = jnp.sum(acc.astype(jnp.int32), axis=(0, 3, 4))       # (num_classes, 2)
    inter = sums[:, 0].astype(jnp.float32)
    denom = sums[:, 1].astype(jnp.float32)
    return (2.0 * inter + _EPS) / (denom + _EPS)


def multi_class_dice_score(outs, labs, num_classes=None, *, ignore_index=None):
    """Pallas implementation of MultiClassDiceScore.forward.

    `ignore_index` is accepted for API parity with the PyTorch module but, as in
    the reference forward(), it is unused.  Pass `num_classes` explicitly in hot
    loops: the implicit path mirrors `round(labs.max().item())`, which costs a
    full device reduction + host sync and one compile per distinct class count.
    Returns [dice_1, ..., dice_C, mean(dice)] (stop-gradient'ed, like .detach()).
    """
    assert outs.shape[0] == 1
    assert outs.shape == labs.shape

    if num_classes is None:
        num_classes = int(round(float(jnp.max(labs))))
    assert num_classes >= 1

    dice = lax.stop_gradient(_dice_scores(outs, labs, num_classes=num_classes))
    scores = [dice[c] for c in range(num_classes)]
    scores.append(jnp.sum(dice) / num_classes)
    return scores


def _reference(outs, labs, num_classes):
    """Pure-JAX reference reproducing the PyTorch forward."""
    scores = []
    avg = jnp.float32(0.0)
    for i in range(1, num_classes + 1):
        co = (outs == i).astype(jnp.float32)
        cl = (labs == i).astype(jnp.float32)
        d = (2.0 * jnp.sum(co * cl) + _EPS) / (jnp.sum(co) + jnp.sum(cl) + _EPS)
        scores.append(d)
        avg = avg + d
    scores.append(avg / num_classes)
    return scores


if __name__ == "__main__":
    key = jax.random.PRNGKey(0)
    k_outs, k_labs = jax.random.split(key)

    # Batch must be 1 (the module asserts it); small 3-D volume, classes 0..3.
    shape = (1, 1, 4, 16, 16)
    outs = jax.random.randint(k_outs, shape, minval=0, maxval=4, dtype=jnp.int32)
    labs = jax.random.randint(k_labs, shape, minval=0, maxval=4, dtype=jnp.int32)

    # Same rule as the PyTorch module (round(labs.max())), computed once here
    # and passed statically per the performance guidance.
    num_classes = int(round(float(jnp.max(labs))))

    scores = multi_class_dice_score(outs, labs, num_classes=num_classes)
    scores = jax.block_until_ready(scores)

    ref = _reference(outs, labs, num_classes)
    assert len(scores) == len(ref) == num_classes + 1
    for got, want in zip(scores, ref):
        assert jnp.allclose(got, want, rtol=1e-6, atol=1e-6), (got, want)

    print("KERNEL_OK")
</pallas_src>

<mosaic_0001>
module attributes {stable_mosaic.version = 11 : i64} {
  func.func @kernel(%arg0: i32, %arg1: i32, %arg2: memref<64x128xi8, #tpu.memory_space<vmem>>, %arg3: memref<64x128xi8, #tpu.memory_space<vmem>>, %arg4: memref<1x3x2x8x128xf32, #tpu.memory_space<vmem>>) attributes {dimension_semantics = [#tpu.dimension_semantics<parallel>, #tpu.dimension_semantics<arbitrary>], iteration_bounds = array<i64: 1, 1>, scalar_prefetch = 0 : i64, scratch_operands = 0 : i64, tpu.core_type = #tpu.core_type<tc>, window_params = [{transform_indices = @transform_0, window_bounds = array<i64: 64, 128>}, {transform_indices = @transform_1, window_bounds = array<i64: 64, 128>}, {transform_indices = @transform_2, window_bounds = array<i64: 1, 3, 2, 8, 128>}]} {
    %cst = arith.constant 0.000000e+00 : f32
    %0 = vector.broadcast %cst : f32 to vector<8x128xf32>
    %cst_0 = arith.constant 0.000000e+00 : f32
    %1 = vector.broadcast %cst_0 : f32 to vector<8x128xf32>
    %cst_1 = arith.constant 0.000000e+00 : f32
    %2 = vector.broadcast %cst_1 : f32 to vector<8x128xf32>
    %cst_2 = arith.constant 0.000000e+00 : f32
    %3 = vector.broadcast %cst_2 : f32 to vector<8x128xf32>
    %cst_3 = arith.constant 0.000000e+00 : f32
    %4 = vector.broadcast %cst_3 : f32 to vector<8x128xf32>
    %cst_4 = arith.constant 0.000000e+00 : f32
    %5 = vector.broadcast %cst_4 : f32 to vector<8x128xf32>
    %c0_i32 = arith.constant 0 : i32
    %c64_i32 = arith.constant 64 : i32
    %6 = arith.muli %c0_i32, %c64_i32 : i32
    %7 = tpu.assume_multiple %6, 64 : i32
    %8 = arith.index_cast %7 : i32 to index
    %c0 = arith.constant 0 : index
    %9 = vector.load %arg2[%8, %c0] : memref<64x128xi8, #tpu.memory_space<vmem>>, vector<64x128xi8>
    %10 = arith.extsi %9 : vector<64x128xi8> to vector<64x128xi32>
    %11 = arith.index_cast %7 : i32 to index
    %c0_5 = arith.constant 0 : index
    %12 = vector.load %arg3[%11, %c0_5] : memref<64x128xi8, #tpu.memory_space<vmem>>, vector<64x128xi8>
    %13 = arith.extsi %12 : vector<64x128xi8> to vector<64x128xi32>
    %c1_i32 = arith.constant 1 : i32
    %14 = vector.broadcast %c1_i32 : i32 to vector<64x128xi32>
    %15 = arith.cmpi eq, %10, %14 : vector<64x128xi32>
    %c1_i32_6 = arith.constant 1 : i32
    %16 = vector.broadcast %c1_i32_6 : i32 to vector<64x128xi32>
    %17 = arith.cmpi eq, %13, %16 : vector<64x128xi32>
    %18 = arith.andi %15, %17 : vector<64x128xi1>
    %19 = arith.extui %18 : vector<64x128xi1> to vector<64x128xi32>
    %20 = arith.sitofp %19 : vector<64x128xi32> to vector<64x128xf32>
    %21 = arith.extui %15 : vector<64x128xi1> to vector<64x128xi32>
    %22 = arith.sitofp %21 : vector<64x128xi32> to vector<64x128xf32>
    %23 = arith.extui %17 : vector<64x128xi1> to vector<64x128xi32>
    %24 = arith.sitofp %23 : vector<64x128xi32> to vector<64x128xf32>
    %25 = arith.addf %22, %24 : vector<64x128xf32>
    %26 = vector.shape_cast %20 : vector<64x128xf32> to vector<8x8x128xf32>
    %cst_7 = arith.constant dense<0.000000e+00> : vector<8x128xf32>
    %27 = vector.multi_reduction <add>, %26, %cst_7 [0] : vector<8x8x128xf32> to vector<8x128xf32>
    %28 = arith.addf %0, %27 : vector<8x128xf32>
    %29 = vector.shape_cast %25 : vector<64x128xf32> to vector<8x8x128xf32>
    %cst_8 = arith.constant dense<0.000000e+00> : vector<8x128xf32>
    %30 = vector.multi_reduction <add>, %29, %cst_8 [0] : vector<8x8x128xf32> to vector<8x128xf32>
    %31 = arith.addf %1, %30 : vector<8x128xf32>
    %c2_i32 = arith.constant 2 : i32
    %32 = vector.broadcast %c2_i32 : i32 to vector<64x128xi32>
    %33 = arith.cmpi eq, %10, %32 : vector<64x128xi32>
    %c2_i32_9 = arith.constant 2 : i32
    %34 = vector.broadcast %c2_i32_9 : i32 to vector<64x128xi32>
    %35 = arith.cmpi eq, %13, %34 : vector<64x128xi32>
    %36 = arith.andi %33, %35 : vector<64x128xi1>
    %37 = arith.extui %36 : vector<64x128xi1> to vector<64x128xi32>
    %38 = arith.sitofp %37 : vector<64x128xi32> to vector<64x128xf32>
    %39 = arith.extui %33 : vector<64x128xi1> to vector<64x128xi32>
    %40 = arith.sitofp %39 : vector<64x128xi32> to vector<64x128xf32>
    %41 = arith.extui %35 : vector<64x128xi1> to vector<64x128xi32>
    %42 = arith.sitofp %41 : vector<64x128xi32> to vector<64x128xf32>
    %43 = arith.addf %40, %42 : vector<64x128xf32>
    %44 = vector.shape_cast %38 : vector<64x128xf32> to vector<8x8x128xf32>
    %cst_10 = arith.constant dense<0.000000e+00> : vector<8x128xf32>
    %45 = vector.multi_reduction <add>, %44, %cst_10 [0] : vector<8x8x128xf32> to vector<8x128xf32>
    %46 = arith.addf %2, %45 : vector<8x128xf32>
    %47 = vector.shape_cast %43 : vector<64x128xf32> to vector<8x8x128xf32>
    %cst_11 = arith.constant dense<0.000000e+00> : vector<8x128xf32>
    %48 = vector.multi_reduction <add>, %47, %cst_11 [0] : vector<8x8x128xf32> to vector<8x128xf32>
    %49 = arith.addf %3, %48 : vector<8x128xf32>
    %c3_i32 = arith.constant 3 : i32
    %50 = vector.broadcast %c3_i32 : i32 to vector<64x128xi32>
    %51 = arith.cmpi eq, %10, %50 : vector<64x128xi32>
    %c3_i32_12 = arith.constant 3 : i32
    %52 = vector.broadcast %c3_i32_12 : i32 to vector<64x128xi32>
    %53 = arith.cmpi eq, %13, %52 : vector<64x128xi32>
    %54 = arith.andi %51, %53 : vector<64x128xi1>
    %55 = arith.extui %54 : vector<64x128xi1> to vector<64x128xi32>
    %56 = arith.sitofp %55 : vector<64x128xi32> to vector<64x128xf32>
    %57 = arith.extui %51 : vector<64x128xi1> to vector<64x128xi32>
    %58 = arith.sitofp %57 : vector<64x128xi32> to vector<64x128xf32>
    %59 = arith.extui %53 : vector<64x128xi1> to vector<64x128xi32>
    %60 = arith.sitofp %59 : vector<64x128xi32> to vector<64x128xf32>
    %61 = arith.addf %58, %60 : vector<64x128xf32>
    %62 = vector.shape_cast %56 : vector<64x128xf32> to vector<8x8x128xf32>
    %cst_13 = arith.constant dense<0.000000e+00> : vector<8x128xf32>
    %63 = vector.multi_reduction <add>, %62, %cst_13 [0] : vector<8x8x128xf32> to vector<8x128xf32>
    %64 = arith.addf %4, %63 : vector<8x128xf32>
    %65 = vector.shape_cast %61 : vector<64x128xf32> to vector<8x8x128xf32>
    %cst_14 = arith.constant dense<0.000000e+00> : vector<8x128xf32>
    %66 = vector.multi_reduction <add>, %65, %cst_14 [0] : vector<8x8x128xf32> to vector<8x128xf32>
    %67 = arith.addf %5, %66 : vector<8x128xf32>
    %c1_i32_15 = arith.constant 1 : i32
    %c0_i32_16 = arith.constant 0 : i32
    %68 = arith.cmpi eq, %arg1, %c0_i32_16 : i32
    %69 = arith.extui %68 : i1 to i32
    %c0_i32_17 = arith.constant 0 : i32
    %70 = arith.cmpi ne, %69, %c0_i32_17 : i32
    scf.if %70 {
      %cst_76 = arith.constant 0.000000e+00 : f32
      %107 = vector.broadcast %cst_76 : f32 to vector<1x3x2x8x128xf32>
      %c0_77 = arith.constant 0 : index
      %c0_78 = arith.constant 0 : index
      %c0_79 = arith.constant 0 : index
      %c0_80 = arith.constant 0 : index
      %c0_81 = arith.constant 0 : index
      %108 = vector.load %arg4[%c0_77, %c0_78, %c0_79, %c0_80, %c0_81] : memref<1x3x2x8x128xf32, #tpu.memory_space<vmem>>, vector<1x3x2x8x128xf32>
      tpu.vector_store %arg4[%c0_77, %c0_78, %c0_79, %c0_80, %c0_81], %107 {strides = array<i32>} : memref<1x3x2x8x128xf32, #tpu.memory_space<vmem>>, vector<1x3x2x8x128xf32>,
    } else {
    }
    %c0_18 = arith.constant 0 : index
    %c0_19 = arith.constant 0 : index
    %c0_20 = arith.constant 0 : index
    %c0_21 = arith.constant 0 : index
    %c0_22 = arith.constant 0 : index
    %71 = vector.load %arg4[%c0_18, %c0_19, %c0_20, %c0_21, %c0_22] : memref<1x3x2x8x128xf32, #tpu.memory_space<vmem>>, vector<1x1x1x8x128xf32>
    %72 = vector.shape_cast %71 : vector<1x1x1x8x128xf32> to vector<8x128xf32>
    %73 = arith.addf %72, %28 : vector<8x128xf32>
    %c0_23 = arith.constant 0 : index
    %c0_24 = arith.constant 0 : index
    %c0_25 = arith.constant 0 : index
    %c0_26 = arith.constant 0 : index
    %c0_27 = arith.constant 0 : index
    %74 = vector.load %arg4[%c0_23, %c0_24, %c0_25, %c0_26, %c0_27] : memref<1x3x2x8x128xf32, #tpu.memory_space<vmem>>, vector<1x1x1x8x128xf32>
    %75 = vector.shape_cast %74 : vector<1x1x1x8x128xf32> to vector<8x128xf32>
    %76 = vector.shape_cast %73 : vector<8x128xf32> to vector<1x1x1x8x128xf32>
    tpu.vector_store %arg4[%c0_23, %c0_24, %c0_25, %c0_26, %c0_27], %76 {strides = array<i32>} : memref<1x3x2x8x128xf32, #tpu.memory_space<vmem>>, vector<1x1x1x8x128xf32>,
    %c0_28 = arith.constant 0 : index
    %c0_29 = arith.constant 0 : index
    %c1 = arith.constant 1 : index
    %c0_30 = arith.constant 0 : index
    %c0_31 = arith.constant 0 : index
    %77 = vector.load %arg4[%c0_28, %c0_29, %c1, %c0_30, %c0_31] : memref<1x3x2x8x128xf32, #tpu.memory_space<vmem>>, vector<1x1x1x8x128xf32>
    %78 = vector.shape_cast %77 : vector<1x1x1x8x128xf32> to vector<8x128xf32>
    %79 = arith.addf %78, %31 : vector<8x128xf32>
    %c0_32 = arith.constant 0 : index
    %c0_33 = arith.constant 0 : index
    %c1_34 = arith.constant 1 : index
    %c0_35 = arith.constant 0 : index
    %c0_36 = arith.constant 0 : index
    %80 = vector.load %arg4[%c0_32, %c0_33, %c1_34, %c0_35, %c0_36] : memref<1x3x2x8x128xf32, #tpu.memory_space<vmem>>, vector<1x1x1x8x128xf32>
    %81 = vector.shape_cast %80 : vector<1x1x1x8x128xf32> to vector<8x128xf32>
    %82 = vector.shape_cast %79 : vector<8x128xf32> to vector<1x1x1x8x128xf32>
    tpu.vector_store %arg4[%c0_32, %c0_33, %c1_34, %c0_35, %c0_36], %82 {strides = array<i32>} : memref<1x3x2x8x128xf32, #tpu.memory_space<vmem>>, vector<1x1x1x8x128xf32>,
    %c0_37 = arith.constant 0 : index
    %c1_38 = arith.constant 1 : index
    %c0_39 = arith.constant 0 : index
    %c0_40 = arith.constant 0 : index
    %c0_41 = arith.constant 0 : index
    %83 = vector.load %arg4[%c0_37, %c1_38, %c0_39, %c0_40, %c0_41] : memref<1x3x2x8x128xf32, #tpu.memory_space<vmem>>, vector<1x1x1x8x128xf32>
    %84 = vector.shape_cast %83 : vector<1x1x1x8x128xf32> to vector<8x128xf32>
    %85 = arith.addf %84, %46 : vector<8x128xf32>
    %c0_42 = arith.constant 0 : index
    %c1_43 = arith.constant 1 : index
    %c0_44 = arith.constant 0 : index
    %c0_45 = arith.constant 0 : index
    %c0_46 = arith.constant 0 : index
    %86 = vector.load %arg4[%c0_42, %c1_43, %c0_44, %c0_45, %c0_46] : memref<1x3x2x8x128xf32, #tpu.memory_space<vmem>>, vector<1x1x1x8x128xf32>
    %87 = vector.shape_cast %86 : vector<1x1x1x8x128xf32> to vector<8x128xf32>
    %88 = vector.shape_cast %85 : vector<8x128xf32> to vector<1x1x1x8x128xf32>
    tpu.vector_store %arg4[%c0_42, %c1_43, %c0_44, %c0_45, %c0_46], %88 {strides = array<i32>} : memref<1x3x2x8x128xf32, #tpu.memory_space<vmem>>, vector<1x1x1x8x128xf32>,
    %c0_47 = arith.constant 0 : index
    %c1_48 = arith.constant 1 : index
    %c1_49 = arith.constant 1 : index
    %c0_50 = arith.constant 0 : index
    %c0_51 = arith.constant 0 : index
    %89 = vector.load %arg4[%c0_47, %c1_48, %c1_49, %c0_50, %c0_51] : memref<1x3x2x8x128xf32, #tpu.memory_space<vmem>>, vector<1x1x1x8x128xf32>
    %90 = vector.shape_cast %89 : vector<1x1x1x8x128xf32> to vector<8x128xf32>
    %91 = arith.addf %90, %49 : vector<8x128xf32>
    %c0_52 = arith.constant 0 : index
    %c1_53 = arith.constant 1 : index
    %c1_54 = arith.constant 1 : index
    %c0_55 = arith.constant 0 : index
    %c0_56 = arith.constant 0 : index
    %92 = vector.load %arg4[%c0_52, %c1_53, %c1_54, %c0_55, %c0_56] : memref<1x3x2x8x128xf32, #tpu.memory_space<vmem>>, vector<1x1x1x8x128xf32>
    %93 = vector.shape_cast %92 : vector<1x1x1x8x128xf32> to vector<8x128xf32>
    %94 = vector.shape_cast %91 : vector<8x128xf32> to vector<1x1x1x8x128xf32>
    tpu.vector_store %arg4[%c0_52, %c1_53, %c1_54, %c0_55, %c0_56], %94 {strides = array<i32>} : memref<1x3x2x8x128xf32, #tpu.memory_space<vmem>>, vector<1x1x1x8x128xf32>,
    %c0_57 = arith.constant 0 : index
    %c2 = arith.constant 2 : index
    %c0_58 = arith.constant 0 : index
    %c0_59 = arith.constant 0 : index
    %c0_60 = arith.constant 0 : index
    %95 = vector.load %arg4[%c0_57, %c2, %c0_58, %c0_59, %c0_60] : memref<1x3x2x8x128xf32, #tpu.memory_space<vmem>>, vector<1x1x1x8x128xf32>
    %96 = vector.shape_cast %95 : vector<1x1x1x8x128xf32> to vector<8x128xf32>
    %97 = arith.addf %96, %64 : vector<8x128xf32>
    %c0_61 = arith.constant 0 : index
    %c2_62 = arith.constant 2 : index
    %c0_63 = arith.constant 0 : index
    %c0_64 = arith.constant 0 : index
    %c0_65 = arith.constant 0 : index
    %98 = vector.load %arg4[%c0_61, %c2_62, %c0_63, %c0_64, %c0_65] : memref<1x3x2x8x128xf32, #tpu.memory_space<vmem>>, vector<1x1x1x8x128xf32>
    %99 = vector.shape_cast %98 : vector<1x1x1x8x128xf32> to vector<8x128xf32>
    %100 = vector.shape_cast %97 : vector<8x128xf32> to vector<1x1x1x8x128xf32>
    tpu.vector_store %arg4[%c0_61, %c2_62, %c0_63, %c0_64, %c0_65], %100 {strides = array<i32>} : memref<1x3x2x8x128xf32, #tpu.memory_space<vmem>>, vector<1x1x1x8x128xf32>,
    %c0_66 = arith.constant 0 : index
    %c2_67 = arith.constant 2 : index
    %c1_68 = arith.constant 1 : index
    %c0_69 = arith.constant 0 : index
    %c0_70 = arith.constant 0 : index
    %101 = vector.load %arg4[%c0_66, %c2_67, %c1_68, %c0_69, %c0_70] : memref<1x3x2x8x128xf32, #tpu.memory_space<vmem>>, vector<1x1x1x8x128xf32>
    %102 = vector.shape_cast %101 : vector<1x1x1x8x128xf32> to vector<8x128xf32>
    %103 = arith.addf %102, %67 : vector<8x128xf32>
    %c0_71 = arith.constant 0 : index
    %c2_72 = arith.constant 2 : index
    %c1_73 = arith.constant 1 : index
    %c0_74 = arith.constant 0 : index
    %c0_75 = arith.constant 0 : index
    %104 = vector.load %arg4[%c0_71, %c2_72, %c1_73, %c0_74, %c0_75] : memref<1x3x2x8x128xf32, #tpu.memory_space<vmem>>, vector<1x1x1x8x128xf32>
    %105 = vector.shape_cast %104 : vector<1x1x1x8x128xf32> to vector<8x128xf32>
    %106 = vector.shape_cast %103 : vector<8x128xf32> to vector<1x1x1x8x128xf32>
    tpu.vector_store %arg4[%c0_71, %c2_72, %c1_73, %c0_74, %c0_75], %106 {strides = array<i32>} : memref<1x3x2x8x128xf32, #tpu.memory_space<vmem>>, vector<1x1x1x8x128xf32>,
    return
  }
  func.func @transform_0(%arg0: i32, %arg1: i32) -> (i32, i32) {
    %c1_i32 = arith.constant 1 : i32
    %0 = arith.muli %arg0, %c1_i32 : i32
    %1 = arith.addi %0, %arg1 : i32
    %c0_i32 = arith.constant 0 : i32
    %c0_i32_0 = arith.constant 0 : i32
    return %1, %c0_i32 : i32, i32
  }
  func.func @transform_1(%arg0: i32, %arg1: i32) -> (i32, i32) {
    %c1_i32 = arith.constant 1 : i32
    %0 = arith.muli %arg0, %c1_i32 : i32
    %1 = arith.addi %0, %arg1 : i32
    %c0_i32 = arith.constant 0 : i32
    %c0_i32_0 = arith.constant 0 : i32
    return %1, %c0_i32 : i32, i32
  }
  func.func @transform_2(%arg0: i32, %arg1: i32) -> (i32, i32, i32, i32, i32) {
    %c0_i32 = arith.constant 0 : i32
    %c0_i32_0 = arith.constant 0 : i32
    %c0_i32_1 = arith.constant 0 : i32
    %c0_i32_2 = arith.constant 0 : i32
    %c0_i32_3 = arith.constant 0 : i32
    return %arg0, %c0_i32, %c0_i32_0, %c0_i32_1, %c0_i32_2 : i32, i32, i32, i32, i32
  }
}

</mosaic_0001>

<bundles_post_ra>
// kernel: _dice_scores.1
= control target key start
LH: loop header
LB: loop body
LE: loop exit
PB: predicated region body
PF: predicated region fallthrough
CT: control target
= control target key end

     0   :  { %v495_v20 = vmov 0.0   ;;  %s885_s0 = inlined_call_operand.vmem [shape: s8[64,128], index: 0, kind: input, shape index: {}]   ;;  %s886_s1 = inlined_call_operand.vmem [shape: s8[64,128], index: 1, kind: input, shape index: {}]   ;;  %s887_s2 = inlined_call_operand.vmem [shape: f32[1,3,2,8,128], index: 2, kind: output, shape index: {}]  }
   0x1   :  { %v55_v0 = vld [vmem:[%s885_s0] sm:$0xff]  ;;  %v56_v2 = vld [vmem:[%s885_s0 + $0x8] sm:$0xff] }
   0x2   :  { %v65_v1 = vld [vmem:[%s886_s1] sm:$0xff]  ;;  %v520_v3 = vunpack.c.0.s8 %v55_v0  ;;  %v522_v4 = vunpack.c.1.s8 %v55_v0  ;;  %v66_v5 = vld [vmem:[%s886_s1 + $0x8] sm:$0xff]  ;;  %v527_v6 = vunpack.c.2.s8 %v55_v0  ;;  %v535_v10 = vunpack.c.3.s8 %v55_v0 }
   0x3   :  { %v529_v7 = vunpack.c.0.s8 %v65_v1  ;;  %v531_v8 = vunpack.c.1.s8 %v65_v1  ;;  %v533_v9 = vunpack.c.2.s8 %v65_v1  ;;  %v537_v11 = vunpack.c.0.s8 %v56_v2 }
   0x4   :  { %v539_v12 = vunpack.c.1.s8 %v56_v2  ;;  %v541_v13 = vunpack.c.3.s8 %v65_v1  ;;  %v543_v14 = vunpack.c.2.s8 %v56_v2  ;;  %v545_v15 = vunpack.c.3.s8 %v56_v2 }
   0x5   :  { %v547_v16 = vunpack.c.0.s8 %v66_v5  ;;  %vm75_vm0 = vcmp.eq.s32.totalorder %v520_v3, 1  ;;  %v550_v17 = vunpack.c.1.s8 %v66_v5  ;;  %v552_v18 = vunpack.c.2.s8 %v66_v5 }
   0x6   :  { %v554_v19 = vunpack.c.3.s8 %v66_v5  ;;  %vm76_vm1 = vcmp.eq.s32.totalorder %v522_v4, 1  ;;  %vm77_vm2 = vcmp.eq.s32.totalorder %v527_v6, 1  ;;  %vm888_vm3 = vcmp.eq.s32.totalorder %v529_v7, 1 }
   0x7   :  { %vm84_vm4 = vcmp.eq.s32.totalorder %v531_v8, 1  ;;  %vm85_vm5 = vcmp.eq.s32.totalorder %v533_v9, 1  ;;  %vm78_vm6 = vcmp.eq.s32.totalorder %v535_v10, 1  ;;  %vm79_vm7 = vcmp.eq.s32.totalorder %v537_v11, 1  ;;  %vm91_vm10 = vmand %vm75_vm0, %vm888_vm3 }
   0x8   :  { %vm86_vm9 = vcmp.eq.s32.totalorder %v541_v13, 1  ;;  %vm87_vm13 = vcmp.eq.s32.totalorder %v547_v16, 1  ;;  %vm92_vm14 = vmand %vm76_vm1, %vm84_vm4  ;;  %v412_v21 = vsel %vm91_vm10, 1.0, %v495_v20  ;;  %vm88_vm15 = vcmp.eq.s32.totalorder %v550_v17, 1 }
   0x9   :  { %vm89_vm8 = vcmp.eq.s32.totalorder %v552_v18, 1  ;;  %vm90_vm3 = vcmp.eq.s32.totalorder %v554_v19, 1  ;;  %vm93_vm12 = vmand %vm77_vm2, %vm85_vm5  ;;  %v413_v22 = vsel %vm92_vm14, 1.0, %v495_v20  ;;  %v420_v25 = vsel %vm75_vm0, 1.0, %v495_v20 }
   0xa   :  { %vm94_vm11 = vmand %vm78_vm6, %vm86_vm9  ;;  %v414_v23 = vsel %vm93_vm12, 1.0, %v495_v20  ;;  %v155_v24 = vadd.f32 %v413_v22, %v412_v21  ;;  %v421_v26 = vsel %vm76_vm1, 1.0, %v495_v20  ;;  %v422_v28 = vsel %vm77_vm2, 1.0, %v495_v20 }
   0xb   :  { %vm95_vm10 = vmand %vm79_vm7, %vm87_vm13  ;;  %v415_v27 = vsel %vm94_vm11, 1.0, %v495_v20  ;;  %vm895_vm12 = vcmp.eq.s32.totalorder %v529_v7, 1  ;;  %v429_v30 = vsel %vm84_vm4, 1.0, %v495_v20  ;;  %vm896_vm0 = vcmp.eq.s32.totalorder %v539_v12, 1 }
   0xc   :  { %v428_v29 = vsel %vm895_vm12, 1.0, %v495_v20  ;;  %vm96_vm1 = vmand %vm896_vm0, %vm88_vm15  ;;  %v156_v31 = vadd.f32 %v414_v23, %v155_v24  ;;  %v423_v32 = vsel %vm78_vm6, 1.0, %v495_v20  ;;  %v424_v33 = vsel %vm79_vm7, 1.0, %v495_v20 }
   0xd   :  { %v430_v34 = vsel %vm85_vm5, 1.0, %v495_v20  ;;  %vm897_vm2 = vcmp.eq.s32.totalorder %v543_v14, 1  ;;  %v416_v35 = vsel %vm95_vm10, 1.0, %v495_v20  ;;  %vm898_vm11 = vmmov %vm896_vm0  ;;  %vm900_vm7 = vcmp.eq.s32.totalorder %v545_v15, 1 }
   0xe   :  { %vm97_vm4 = vmand %vm897_vm2, %vm89_vm8  ;;  %v425_v36 = vsel %vm898_vm11, 1.0, %v495_v20  ;;  %v427_v38 = vsel %vm900_vm7, 1.0, %v495_v20  ;;  %v157_v39 = vadd.f32 %v415_v27, %v156_v31  ;;  %v431_v40 = vsel %vm86_vm9, 1.0, %v495_v20 }
   0xf   :  { %vm899_vm6 = vmmov %vm897_vm2  ;;  %v147_v41 = vadd.f32 %v428_v29, %v420_v25  ;;  %v148_v42 = vadd.f32 %v429_v30, %v421_v26  ;;  %v417_v43 = vsel %vm96_vm1, 1.0, %v495_v20  ;;  %v432_v44 = vsel %vm87_vm13, 1.0, %v495_v20 }
  0x10   :  { %v426_v37 = vsel %vm899_vm6, 1.0, %v495_v20  ;;  %vm901_vm5 = vmmov %vm900_vm7  ;;  %v433_v45 = vsel %vm88_vm15, 1.0, %v495_v20  ;;  %v149_v46 = vadd.f32 %v430_v34, %v422_v28  ;;  %v418_v47 = vsel %vm97_vm4, 1.0, %v495_v20 }
  0x11   :  { %vm98_vm14 = vmand %vm901_vm5, %vm90_vm3  ;;  %v158_v48 = vadd.f32 %v416_v35, %v157_v39  ;;  %v434_v49 = vsel %vm89_vm8, 1.0, %v495_v20  ;;  %v435_v50 = vsel %vm90_vm3, 1.0, %v495_v20  ;;  %v150_v52 = vadd.f32 %v431_v40, %v423_v32 }
  0x12   :  { %v419_v51 = vsel %vm98_vm14, 1.0, %v495_v20  ;;  %v163_v53 = vadd.f32 %v148_v42, %v147_v41  ;;  %vm171_vm9 = vcmp.eq.s32.totalorder %v520_v3, 2  ;;  %v151_v55 = vadd.f32 %v432_v44, %v424_v33 }
  0x13   :  { %v159_v54 = vadd.f32 %v417_v43, %v158_v48  ;;  %v152_v56 = vadd.f32 %v433_v45, %v425_v36  ;;  %vm172_vm13 = vcmp.eq.s32.totalorder %v522_v4, 2  ;;  %vm173_vm15 = vcmp.eq.s32.totalorder %v527_v6, 2 }
  0x14   :  { %v164_v57 = vadd.f32 %v163_v53, %v149_v46  ;;  %vm174_vm8 = vcmp.eq.s32.totalorder %v535_v10, 2  ;;  %vm890_vm10 = vcmp.eq.s32.totalorder %v529_v7, 2  ;;  %vm889_vm3 = vcmp.eq.s32.totalorder %v531_v8, 2 }
  0x15   :  { %v160_v58 = vadd.f32 %v418_v47, %v159_v54  ;;  %vm181_vm12 = vcmp.eq.s32.totalorder %v533_v9, 2  ;;  %vm891_vm0 = vcmp.eq.s32.totalorder %v541_v13, 2  ;;  %vm187_vm1 = vmand %vm171_vm9, %vm890_vm10  ;;  %vm175_vm2 = vcmp.eq.s32.totalorder %v537_v11, 2 }
  0x16   :  { %v165_v59 = vadd.f32 %v164_v57, %v150_v52  ;;  %vm176_vm4 = vcmp.eq.s32.totalorder %v539_v12, 2  ;;  %vm183_vm11 = vcmp.eq.s32.totalorder %v547_v16, 2  ;;  %vm188_vm6 = vmand %vm172_vm13, %vm889_vm3  ;;  %vm184_vm7 = vcmp.eq.s32.totalorder %v550_v17, 2 }
  0x17   :  { %v161_v60 = vadd.f32 %v419_v51, %v160_v58  ;;  %vm189_vm5 = vmand %vm173_vm15, %vm181_vm12  ;;  %v436_v61 = vsel %vm187_vm1, 1.0, %v495_v20  ;;  %v437_v62 = vsel %vm188_vm6, 1.0, %v495_v20  ;;  %v153_v63 = vadd.f32 %v434_v49, %v426_v37 }
  0x18   :  { %v166_v0 = vadd.f32 %v165_v59, %v151_v55  ;;  %vm190_vm14 = vmand %vm174_vm8, %vm891_vm0  ;;  %v438_v1 = vsel %vm189_vm5, 1.0, %v495_v20  ;;  %v251_v2 = vadd.f32 %v437_v62, %v436_v61  ;;  %vm177_vm3 = vcmp.eq.s32.totalorder %v543_v14, 2 }
  0x19   :  { %vm185_vm10 = vcmp.eq.s32.totalorder %v552_v18, 2  ;;  %vm191_vm1 = vmand %vm175_vm2, %vm183_vm11  ;;  %v439_v5 = vsel %vm190_vm14, 1.0, %v495_v20  ;;  %v154_v21 = vadd.f32 %v435_v50, %v427_v38  ;;  %375 = vst [vmem:[%s887_s2] sm:$0xff] %v161_v60  ;;  %vm178_vm5 = vcmp.eq.s32.totalorder %v545_v15, 2 }
  0x1a   :  { %v167_v22 = vadd.f32 %v166_v0, %v152_v56  ;;  %vm192_vm6 = vmand %vm176_vm4, %vm184_vm7  ;;  %v252_v23 = vadd.f32 %v438_v1, %v251_v2  ;;  %vm186_vm0 = vcmp.eq.s32.totalorder %v554_v19, 2  ;;  %v440_v24 = vsel %vm191_vm1, 1.0, %v495_v20 }
  0x1b   :  { %v444_v25 = vsel %vm171_vm9, 1.0, %v495_v20  ;;  %vm193_vm14 = vmand %vm177_vm3, %vm185_vm10  ;;  %v445_v28 = vsel %vm172_vm13, 1.0, %v495_v20  ;;  %v446_v29 = vsel %vm173_vm15, 1.0, %v495_v20  ;;  %v441_v30 = vsel %vm192_vm6, 1.0, %v495_v20 }
  0x1c   :  { %v168_v26 = vadd.f32 %v167_v22, %v153_v63  ;;  %v253_v27 = vadd.f32 %v439_v5, %v252_v23  ;;  %vm902_vm9 = vcmp.eq.s32.totalorder %v529_v7, 2  ;;  %vm903_vm1 = vcmp.eq.s32.totalorder %v531_v8, 2  ;;  %vm194_vm13 = vmand %vm178_vm5, %vm186_vm0 }
  0x1d   :  { %v452_v31 = vsel %vm902_vm9, 1.0, %v495_v20  ;;  %v453_v32 = vsel %vm903_vm1, 1.0, %v495_v20  ;;  %v454_v33 = vsel %vm181_vm12, 1.0, %v495_v20  ;;  %v447_v36 = vsel %vm174_vm8, 1.0, %v495_v20 }
  0x1e   :  { %v169_v34 = vadd.f32 %v168_v26, %v154_v21  ;;  %v254_v35 = vadd.f32 %v440_v24, %v253_v27  ;;  %v448_v37 = vsel %vm175_vm2, 1.0, %v495_v20  ;;  %v442_v38 = vsel %vm193_vm14, 1.0, %v495_v20 }
  0x1f   :  { %vm904_vm15 = vcmp.eq.s32.totalorder %v541_v13, 2  ;;  %v456_v40 = vsel %vm183_vm11, 1.0, %v495_v20  ;;  %v243_v41 = vadd.f32 %v452_v31, %v444_v25  ;;  %v244_v43 = vadd.f32 %v453_v32, %v445_v28 }
  0x20   :  { %v455_v39 = vsel %vm904_vm15, 1.0, %v495_v20  ;;  %v255_v42 = vadd.f32 %v441_v30, %v254_v35  ;;  %v245_v44 = vadd.f32 %v454_v33, %v446_v29  ;;  %v443_v45 = vsel %vm194_vm13, 1.0, %v495_v20  ;;  %485 = vst [vmem:[%s887_s2 + $0x8] sm:$0xff] %v169_v34 }
  0x21   :  { %v449_v46 = vsel %vm176_vm4, 1.0, %v495_v20  ;;  %v450_v47 = vsel %vm177_vm3, 1.0, %v495_v20  ;;  %v457_v48 = vsel %vm184_vm7, 1.0, %v495_v20  ;;  %v451_v50 = vsel %vm178_vm5, 1.0, %v495_v20 }
  0x22   :  { %v256_v49 = vadd.f32 %v442_v38, %v255_v42  ;;  %v246_v51 = vadd.f32 %v455_v39, %v447_v36  ;;  %v259_v52 = vadd.f32 %v244_v43, %v243_v41  ;;  %v458_v53 = vsel %vm185_vm10, 1.0, %v495_v20 }
  0x23   :  { %v459_v54 = vsel %vm186_vm0, 1.0, %v495_v20  ;;  %v247_v55 = vadd.f32 %v456_v40, %v448_v37  ;;  %vm267_vm8 = vcmp.eq.s32.totalorder %v520_v3, 3  ;;  %v248_v57 = vadd.f32 %v457_v48, %v449_v46 }
  0x24   :  { %v257_v56 = vadd.f32 %v443_v45, %v256_v49  ;;  %v260_v58 = vadd.f32 %v259_v52, %v245_v44  ;;  %vm268_vm3 = vcmp.eq.s32.totalorder %v522_v4, 3  ;;  %vm894_vm12 = vcmp.eq.s32.totalorder %v527_v6, 3 }
  0x25   :  { %vm275_vm2 = vcmp.eq.s32.totalorder %v529_v7, 3  ;;  %vm892_vm4 = vcmp.eq.s32.totalorder %v531_v8, 3  ;;  %vm893_vm10 = vcmp.eq.s32.totalorder %v533_v9, 3  ;;  %vm270_vm11 = vcmp.eq.s32.totalorder %v535_v10, 3 }
  0x26   :  { %v261_v59 = vadd.f32 %v260_v58, %v246_v51  ;;  %vm278_vm0 = vcmp.eq.s32.totalorder %v541_v13, 3  ;;  %vm283_vm7 = vmand %vm267_vm8, %vm275_vm2  ;;  %v249_v60 = vadd.f32 %v458_v53, %v450_v47  ;;  %vm271_vm6 = vcmp.eq.s32.totalorder %v537_v11, 3  ;;  %487 = vst [vmem:[%s887_s2 + $0x10] sm:$0xff] %v257_v56 }
  0x27   :  { %vm279_vm5 = vcmp.eq.s32.totalorder %v547_v16, 3  ;;  %vm284_vm14 = vmand %vm268_vm3, %vm892_vm4  ;;  %v460_v61 = vsel %vm283_vm7, 1.0, %v495_v20  ;;  %vm272_vm9 = vcmp.eq.s32.totalorder %v539_v12, 3  ;;  %vm280_vm1 = vcmp.eq.s32.totalorder %v550_v17, 3 }
  0x28   :  { %v262_v62 = vadd.f32 %v261_v59, %v247_v55  ;;  %vm285_vm13 = vmand %vm894_vm12, %vm893_vm10  ;;  %v461_v63 = vsel %vm284_vm14, 1.0, %v495_v20  ;;  %v250_v0 = vadd.f32 %v459_v54, %v451_v50  ;;  %vm273_vm7 = vcmp.eq.s32.totalorder %v543_v14, 3 }
  0x29   :  { %vm286_vm15 = vmand %vm270_vm11, %vm278_vm0  ;;  %v462_v1 = vsel %vm285_vm13, 1.0, %v495_v20  ;;  %v347_v2 = vadd.f32 %v461_v63, %v460_v61  ;;  %vm281_vm4 = vcmp.eq.s32.totalorder %v552_v18, 3  ;;  %vm274_vm14 = vcmp.eq.s32.totalorder %v545_v15, 3 }
  0x2a   :  { %v263_v5 = vadd.f32 %v262_v62, %v248_v57  ;;  %vm287_vm10 = vmand %vm271_vm6, %vm279_vm5  ;;  %v463_v21 = vsel %vm286_vm15, 1.0, %v495_v20  ;;  %vm282_vm12 = vcmp.eq.s32.totalorder %v554_v19, 3  ;;  %v468_v23 = vsel %vm267_vm8, 1.0, %v495_v20 }
  0x2b   :  { %vm288_vm13 = vmand %vm272_vm9, %vm280_vm1  ;;  %v348_v22 = vadd.f32 %v462_v1, %v347_v2  ;;  %v464_v25 = vsel %vm287_vm10, 1.0, %v495_v20  ;;  %v469_v26 = vsel %vm268_vm3, 1.0, %v495_v20  ;;  %v476_v27 = vsel %vm275_vm2, 1.0, %v495_v20 }
  0x2c   :  { %v264_v24 = vadd.f32 %v263_v5, %v249_v60  ;;  %vm289_vm15 = vmand %vm273_vm7, %vm281_vm4  ;;  %vm905_vm8 = vcmp.eq.s32.totalorder %v527_v6, 3  ;;  %vm906_vm10 = vcmp.eq.s32.totalorder %v531_v8, 3  ;;  %vm907_vm3 = vcmp.eq.s32.totalorder %v533_v9, 3 }
  0x2d   :  { %v349_v28 = vadd.f32 %v463_v21, %v348_v22  ;;  %v470_v3 = vsel %vm905_vm8, 1.0, %v495_v20  ;;  %v477_v29 = vsel %vm906_vm10, 1.0, %v495_v20  ;;  %v478_v4 = vsel %vm907_vm3, 1.0, %v495_v20  ;;  %vm290_vm2 = vmand %vm274_vm14, %vm282_vm12 }
  0x2e   :  { %v265_v7 = vadd.f32 %v264_v24, %v250_v0  ;;  %v465_v30 = vsel %vm288_vm13, 1.0, %v495_v20  ;;  %v471_v6 = vsel %vm270_vm11, 1.0, %v495_v20  ;;  %v479_v8 = vsel %vm278_vm0, 1.0, %v495_v20 }
  0x2f   :  { %v350_v31 = vadd.f32 %v464_v25, %v349_v28  ;;  %v339_v32 = vadd.f32 %v476_v27, %v468_v23  ;;  %v466_v9 = vsel %vm289_vm15, 1.0, %v495_v20  ;;  %v340_v33 = vadd.f32 %v477_v29, %v469_v26 }
  0x30   :  { %v341_v34 = vadd.f32 %v478_v4, %v470_v3  ;;  %v472_v36 = vsel %vm271_vm6, 1.0, %v495_v20  ;;  %v480_v37 = vsel %vm279_vm5, 1.0, %v495_v20  ;;  %489 = vst [vmem:[%s887_s2 + $0x18] sm:$0xff] %v265_v7  ;;  %v467_v10 = vsel %vm290_vm2, 1.0, %v495_v20 }
  0x31   :  { %v351_v35 = vadd.f32 %v465_v30, %v350_v31  ;;  %v342_v13 = vadd.f32 %v479_v8, %v471_v6  ;;  %v355_v38 = vadd.f32 %v340_v33, %v339_v32  ;;  %v473_v40 = vsel %vm272_vm9, 1.0, %v495_v20 }
  0x32   :  { %v481_v11 = vsel %vm280_vm1, 1.0, %v495_v20  ;;  %v343_v41 = vadd.f32 %v480_v37, %v472_v36  ;;  %v474_v43 = vsel %vm273_vm7, 1.0, %v495_v20  ;;  %v482_v44 = vsel %vm281_vm4, 1.0, %v495_v20 }
  0x33   :  { %v352_v39 = vadd.f32 %v466_v9, %v351_v35  ;;  %v356_v16 = vadd.f32 %v355_v38, %v341_v34  ;;  %v344_v45 = vadd.f32 %v481_v11, %v473_v40  ;;  %v475_v12 = vsel %vm274_vm14, 1.0, %v495_v20 }
  0x34   :  { %v483_v17 = vsel %vm282_vm12, 1.0, %v495_v20  ;;  %v345_v47 = vadd.f32 %v482_v44, %v474_v43 }
  0x35   :  { %v353_v42 = vadd.f32 %v467_v10, %v352_v39  ;;  %v357_v46 = vadd.f32 %v356_v16, %v342_v13  ;;  %v346_v14 = vadd.f32 %v483_v17, %v475_v12 }
  0x37   :  { %v358_v48 = vadd.f32 %v357_v46, %v343_v41  ;;  %491 = vst [vmem:[%s887_s2 + $0x20] sm:$0xff] %v353_v42 }
  0x39   :  { %v359_v49 = vadd.f32 %v358_v48, %v344_v45 }
  0x3b   :  { %v360_v18 = vadd.f32 %v359_v49, %v345_v47 }
  0x3d   :  { %v361_v50 = vadd.f32 %v360_v18, %v346_v14 }
  0x3f   :  { %493 = vst [vmem:[%s887_s2 + $0x28] sm:$0xff] %v361_v50 }

</bundles_post_ra>
